<compile_context>
chip_gen: v7x
topology: tpu7x:2x2x1
jax: 0.10.0
libtpu: 0.0.40
codegen_flags: <defaults>
</compile_context>

<pallas_src>
import functools

import jax
import jax.numpy as jnp
from jax.experimental import pallas as pl
from jax.experimental.pallas import tpu as pltpu


def _round_up(a, b):
    return (a + b - 1) // b * b


def _outconv_kernel(w_ref, b_ref, x_ref, o_ref):
    # w_ref: (Cout, Cin)  b_ref: (Cout, 1)  x_ref: (Cin, t)  o_ref: (Cout, t)
    acc = jnp.dot(w_ref[...], x_ref[...], preferred_element_type=jnp.float32)
    o_ref[...] = (acc + b_ref[...]).astype(o_ref.dtype)


@functools.partial(jax.jit, static_argnames=("t_hw",))
def outconv_forward(x_nchw, weight, bias, *, t_hw=1024):
    """1x1 conv forward.

    x_nchw: (N, Cin, H, W)
    weight: (Cout, Cin)   -- squeezed from PyTorch's (Cout, Cin, 1, 1)
    bias:   (Cout,)
    returns (N, Cout, H, W)
    """
    N, Cin, H, W = x_nchw.shape
    Cout = weight.shape[0]
    HW = H * W

    # Spatial tile: large (512-2048 is the mem-bound sweet spot), lane-aligned,
    # but capped at the lane-aligned spatial extent so small images still work.
    # Per-tile VMEM footprint is (Cin + Cout) * t * 4B, double-buffered -> tiny
    # for typical channel counts, so the default scoped VMEM limit is ample.
    t = min(_round_up(t_hw, 128), _round_up(HW, 128))
    HW_pad = _round_up(HW, t)

    # NCHW -> (N, Cin, H*W): a reshape of a contiguous array, no data movement.
    x = x_nchw.reshape(N, Cin, HW)
    if HW_pad != HW:
        x = jnp.pad(x, ((0, 0), (0, 0), (0, HW_pad - HW)))

    b2 = bias.reshape(Cout, 1).astype(jnp.float32)

    grid = (N, HW_pad // t)

    itemsize = jnp.dtype(x_nchw.dtype).itemsize
    cost = pl.CostEstimate(
        flops=2 * N * HW_pad * Cin * Cout,
        transcendentals=0,
        bytes_accessed=(N * Cin * HW_pad + Cout * Cin + Cout
                        + N * Cout * HW_pad) * itemsize,
    )

    y = pl.pallas_call(
        _outconv_kernel,
        out_shape=jax.ShapeDtypeStruct((N, Cout, HW_pad), x_nchw.dtype),
        grid=grid,
        in_specs=[
            # Weight / bias: tiny, resident, same block every step.
            pl.BlockSpec((Cout, Cin), lambda n, j: (0, 0)),
            pl.BlockSpec((Cout, 1), lambda n, j: (0, 0)),
            # Activations: lane-dense (Cin, t) slab per grid step.
            # TODO(synk): if xprof ever shows exposed DMA here, bump the
            # activation BlockSpec to pipeline_mode=pl.Buffered(3).
            pl.BlockSpec((None, Cin, t), lambda n, j: (n, 0, j)),
        ],
        # Lane-dense output slab (t is a multiple of 128) -> unmasked stores.
        out_specs=pl.BlockSpec((None, Cout, t), lambda n, j: (n, 0, j)),
        compiler_params=pltpu.CompilerParams(
            dimension_semantics=("parallel", "parallel"),
        ),
        cost_estimate=cost,
    )(weight, b2, x)

    # (N, Cout, HW_pad) -> drop spatial padding -> NCHW
    return y[:, :, :HW].reshape(N, Cout, H, W)


def init_outconv_params(key, in_channels, out_channels, dtype=jnp.float32):
    """Deterministic init mimicking nn.Conv2d defaults (uniform +-1/sqrt(fan_in))."""
    k_w, k_b = jax.random.split(key)
    bound = 1.0 / jnp.sqrt(in_channels)
    # Keep the PyTorch parameter shape (Cout, Cin, 1, 1) for spec fidelity.
    weight4 = jax.random.uniform(
        k_w, (out_channels, in_channels, 1, 1), dtype, minval=-bound, maxval=bound
    )
    bias = jax.random.uniform(
        k_b, (out_channels,), dtype, minval=-bound, maxval=bound
    )
    return weight4, bias


if __name__ == "__main__":
    key = jax.random.PRNGKey(0)
    k_x, k_p = jax.random.split(key)

    N, Cin, H, W = 2, 4, 16, 16
    Cout = 3

    x = jax.random.normal(k_x, (N, Cin, H, W), jnp.float32)
    weight4, bias = init_outconv_params(k_p, Cin, Cout)
    weight = weight4.reshape(Cout, Cin)  # squeeze the 1x1 kernel dims

    y = outconv_forward(x, weight, bias)
    y = jax.block_until_ready(y)

    # Reference check against plain-JAX einsum (same 1x1 conv semantics).
    y_ref = jnp.einsum("nchw,oc->nohw", x, weight) + bias[None, :, None, None]
    assert y.shape == (N, Cout, H, W)
    assert jnp.allclose(y, y_ref, atol=1e-5, rtol=1e-5)

    # Also exercise a non-divisible spatial size (padding path).
    x2 = jax.random.normal(k_x, (N, Cin, 13, 11), jnp.float32)
    y2 = jax.block_until_ready(outconv_forward(x2, weight, bias))
    y2_ref = jnp.einsum("nchw,oc->nohw", x2, weight) + bias[None, :, None, None]
    assert y2.shape == (N, Cout, 13, 11)
    assert jnp.allclose(y2, y2_ref, atol=1e-5, rtol=1e-5)

    print("KERNEL_OK")
</pallas_src>

<mosaic_0001>
module attributes {stable_mosaic.version = 11 : i64} {
  func.func @_outconv_kernel(%arg0: i32, %arg1: i32, %arg2: memref<3x4xf32, #tpu.memory_space<vmem>>, %arg3: memref<3x1xf32, #tpu.memory_space<vmem>>, %arg4: memref<1x4x256xf32, #tpu.memory_space<vmem>>, %arg5: memref<1x3x256xf32, #tpu.memory_space<vmem>>) attributes {dimension_semantics = [#tpu.dimension_semantics<parallel>, #tpu.dimension_semantics<parallel>], iteration_bounds = array<i64: 2, 1>, scalar_prefetch = 0 : i64, scratch_operands = 0 : i64, tpu.core_type = #tpu.core_type<tc>, window_params = [{pipeline_mode = #tpu.pipeline_mode<synchronous>, transform_indices = @transform_0, window_bounds = array<i64: 3, 4>}, {pipeline_mode = #tpu.pipeline_mode<synchronous>, transform_indices = @transform_1, window_bounds = array<i64: 3, 1>}, {transform_indices = @transform_2, window_bounds = array<i64: 1, 4, 256>}, {transform_indices = @transform_3, window_bounds = array<i64: 1, 3, 256>}]} {
    %c0 = arith.constant 0 : index
    %c0_0 = arith.constant 0 : index
    %0 = vector.load %arg2[%c0, %c0_0] : memref<3x4xf32, #tpu.memory_space<vmem>>, vector<3x4xf32>
    %c0_1 = arith.constant 0 : index
    %c0_2 = arith.constant 0 : index
    %c0_3 = arith.constant 0 : index
    %1 = vector.load %arg4[%c0_1, %c0_2, %c0_3] : memref<1x4x256xf32, #tpu.memory_space<vmem>>, vector<1x4x256xf32>
    %2 = vector.shape_cast %1 : vector<1x4x256xf32> to vector<4x256xf32>
    %cst = arith.constant dense<0.000000e+00> : vector<3x256xf32>
    %3 = tpu.matmul %0, %2, %cst {dimension_numbers = #tpu.dot_dimension_numbers<[1], [0], [0], [1], [0, 0, 1, 1], [], []>} : vector<3x4xf32>, vector<4x256xf32>, vector<3x256xf32> -> vector<3x256xf32>
    %c0_4 = arith.constant 0 : index
    %c0_5 = arith.constant 0 : index
    %4 = vector.load %arg3[%c0_4, %c0_5] : memref<3x1xf32, #tpu.memory_space<vmem>>, vector<3x1xf32>
    %5 = vector.broadcast %4 : vector<3x1xf32> to vector<3x256xf32>
    %6 = arith.addf %3, %5 : vector<3x256xf32>
    %c0_6 = arith.constant 0 : index
    %c0_7 = arith.constant 0 : index
    %c0_8 = arith.constant 0 : index
    %7 = vector.load %arg5[%c0_6, %c0_7, %c0_8] : memref<1x3x256xf32, #tpu.memory_space<vmem>>, vector<1x3x256xf32>
    %8 = vector.shape_cast %7 : vector<1x3x256xf32> to vector<3x256xf32>
    %9 = vector.shape_cast %6 : vector<3x256xf32> to vector<1x3x256xf32>
    tpu.vector_store %arg5[%c0_6, %c0_7, %c0_8], %9 {strides = array<i32>} : memref<1x3x256xf32, #tpu.memory_space<vmem>>, vector<1x3x256xf32>,
    return
  }
  func.func @transform_0(%arg0: i32, %arg1: i32) -> (i32, i32) {
    %c0_i32 = arith.constant 0 : i32
    %c0_i32_0 = arith.constant 0 : i32
    %c0_i32_1 = arith.constant 0 : i32
    return %c0_i32, %c0_i32_0 : i32, i32
  }
  func.func @transform_1(%arg0: i32, %arg1: i32) -> (i32, i32) {
    %c0_i32 = arith.constant 0 : i32
    %c0_i32_0 = arith.constant 0 : i32
    %c0_i32_1 = arith.constant 0 : i32
    return %c0_i32, %c0_i32_0 : i32, i32
  }
  func.func @transform_2(%arg0: i32, %arg1: i32) -> (i32, i32, i32) {
    %c0_i32 = arith.constant 0 : i32
    %c0_i32_0 = arith.constant 0 : i32
    return %arg0, %c0_i32, %arg1 : i32, i32, i32
  }
  func.func @transform_3(%arg0: i32, %arg1: i32) -> (i32, i32, i32) {
    %c0_i32 = arith.constant 0 : i32
    %c0_i32_0 = arith.constant 0 : i32
    return %arg0, %c0_i32, %arg1 : i32, i32, i32
  }
}

</mosaic_0001>

<bundles_post_ra>
// kernel: outconv_forward.1
= control target key start
LH: loop header
LB: loop body
LE: loop exit
PB: predicated region body
PF: predicated region fallthrough
CT: control target
= control target key end

     0   :  { %s482_s12 = smov 0   ;;  %s484_s13 = smov 0   ;;  %s521_s0 = inlined_call_operand.vmem [shape: f32[3,4], index: 0, kind: input, shape index: {}]   ;;  %s522_s1 = inlined_call_operand.vmem [shape: f32[3,1], index: 1, kind: input, shape index: {}]   ;;  %s523_s2 = inlined_call_operand.vmem [shape: f32[2,4,256], index: 2, kind: input, shape index: {}]   ;;  %s524_s3 = inlined_call_operand.vmem [shape: f32[2,3,256], index: 3, kind: output, shape index: {}]  }
   0x1   :  { %s486_s14 = smov 0  }
   0x2 LB: > { %s25_s15 = sadd.s32 1, %s454_s13  ;;  %p396_p0 = scmp.ge.s32.totalorder %s458_s14, 1  ;;  %s458_s14 = sphi %s486_s14, %s13_s14   ;;  %s454_s13 = sphi %s484_s13, %s526_s13   ;;  %s450_s12 = sphi %s482_s12, %s525_s12  }
   0x3   : > { %p27_p1 = scmp.ge.s32.totalorder %s25_s15, 2  ;;  %p158_p2 = scmp.lt.s32.totalorder %s458_s14, 3 }
   0x5   : > { %s528_s15 = smov (%p27_p1, %s25_s15), 0  ;;  %p159_p3 = pnand %p396_p0, %p158_p2 }
   0x6   : > { %p191_p4 = scmp.lt.s32.totalorder (!%p159_p3), %s450_s12, 1  ;;  %v460_v0 = vmov (!%p159_p3), 0.0   ;;  %v212_v1 = vld [vmem:[%s522_s1] sm:$0x7] (!%p159_p3)  ;;  %v461_v2 = vmov (!%p159_p3), 0   ;;  %vm224_vm0 = vcmask (!%p159_p3), 1043456  }
   0x7   : > { %162 = sbr.rel (%p159_p3) target bundleno = 240 (0xf0), region = 32  ;;  %293 = vmatprep.mubr.f32.mxu0 (!%p159_p3), %v460_v0  ;;  %434 = vset.pattern.permute.xlu0 (!%p159_p3), %v461_v2  ;;  %v210_v5 = vld [vmem:[%s521_s0] sm:$0x7] (!%p159_p3)  ;;  %vm220_vm1 = vcmask (!%p159_p3), 31744  }
   0x8   : > { %215 = vperm.xlu0 (!%p159_p3), %434, %v212_v1  }
   0xe   : > { %s530_s12 = smov (!%p191_p4, %s450_s12), 1 }
   0xf   : > { %s406_s18 = sshll.u32 %s530_s12, 3 }
  0x10   : > { %s198_s21 = scalar_lea.vmem %s523_s2, %s406_s18  ;;  %s208_s26 = scalar_lea.vmem %s524_s3, %s406_s18 }
  0x11   : > { %v211_v3 = vld [vmem:[%s198_s21] sm:$0xff] }
  0x12   : > { %v219_v4 = vcombine.high %v211_v3, %v211_v3 }
  0x14   : > { %401 = vmatprep.subr.msk.mxu0 %vm224_vm0, %v219_v4 }
  0x15   : > { %402 = vmatpush1.msk.msra.mxu0 %vm224_vm0, %v211_v3 }
  0x16   : > { %403 = vmatmul.mubr.msk.f32.vlgmr.msra.gmra.mrb[0].mxu0 %vm220_vm1, %v210_v5 }
  0x87   : > { %v216_v6 = vpop.permute.xlu0 %215 }
  0xe9   : > { %v295_v7 = vpop.f32.mrb[0].mxu0 }
  0xea   : > { %v296_v8 = vadd.f32 %v295_v7, %v216_v6  ;;  %v297_v9 = vpop.f32.mrb[1].mxu0 }
  0xeb   : > { %v298_v10 = vadd.f32 %v297_v9, %v216_v6 }
  0xed   : > { %v302_v11 = vcombine.low %v296_v8, %v298_v10 }
  0xef   : > { %304 = vst [vmem:[%s208_s26] sm:$0x77] %v302_v11 }
  0xf0 PF: > { %s13_s14 = sadd.s32 1, %s458_s14   ;;  %s525_s12 = smov %s454_s13 }
  0xf1   : > { %p10_p5 = scmp.ge.s32.totalorder %s13_s14, 4   ;;  %s526_s13 = smov %s528_s15 }
  0xf3   :  { %12 = sbr.rel (!%p10_p5) target bundleno = 2 (0x2), region = 62 }

</bundles_post_ra>
